<compile_context>
chip_gen: v7x
topology: tpu7x:2x2x1
jax: 0.10.0
libtpu: 0.0.40
codegen_flags: <defaults>
</compile_context>

<pallas_src>
import math
from functools import partial

import numpy as np
import jax
import jax.numpy as jnp
from jax.experimental import pallas as pl
from jax.experimental.pallas import tpu as pltpu

ROWS = 12        # rows in the per-pulse output slab
SROWS = 16       # scratch rows (padded to two full f32 vregs)
LANES = 128


def _epg_mt_kernel(ca_ref, sa_ref, cb_ref, sb_ref, prm_ref, out_ref, st,
                   *, chunk, n_states):
    c_idx = pl.program_id(0)

    # ---- loop-invariant scalars (precomputed on host, read from SMEM) ----
    E1f = prm_ref[0]; E2f = prm_ref[1]; E1b = prm_ref[2]; E2b = prm_ref[3]
    kf = prm_ref[4]; kb = prm_ref[5]; trs = prm_ref[6]
    cph = prm_ref[7]; sph = prm_ref[8]
    wf = prm_ref[9]; wb = prm_ref[10]
    rfw = prm_ref[11]; rbw = prm_ref[12]     # (1-E1f)*wf, (1-E1b)*wb

    lane = jax.lax.broadcasted_iota(jnp.int32, (1, LANES), 1)
    fp_keep = (lane >= 1) & (lane < n_states)   # Fp[0] = 0, clear pad lanes
    fm_keep = lane < (n_states - 1)             # Fm[-1] = 0, clear pad lanes

    # ---- initialize carried state on the very first grid step: Z_f[0]=wf, Z_b[0]=wb ----
    @pl.when(c_idx == 0)
    def _():
        row2 = jax.lax.broadcasted_iota(jnp.int32, (SROWS, LANES), 0)
        lane2 = jax.lax.broadcasted_iota(jnp.int32, (SROWS, LANES), 1)
        init = jnp.where((row2 == 8) & (lane2 == 0), wf,
                         jnp.where((row2 == 10) & (lane2 == 0), wb, 0.0))
        st[...] = init.astype(jnp.float32)

    # ---- load carried state into registers (once per grid step) ----
    carry0 = (st[0:1, :], st[1:2, :], st[2:3, :], st[3:4, :],
              st[4:5, :], st[5:6, :], st[6:7, :], st[7:8, :],
              st[8:9, :], st[9:10, :], st[10:11, :], st[11:12, :])

    def body(j, carry):
        (fpf_r, fpf_i, fpb_r, fpb_i, fmf_r, fmf_i, fmb_r, fmb_i,
         zf_r, zf_i, zb_r, zb_i) = carry
        p = c_idx * chunk + j          # global pulse index

        # ---- relaxation + MT exchange ----
        fpf_r = E2f * fpf_r; fpf_i = E2f * fpf_i
        fmf_r = E2f * fmf_r; fmf_i = E2f * fmf_i
        fpb_r = E2b * fpb_r; fpb_i = E2b * fpb_i
        fmb_r = E2b * fmb_r; fmb_i = E2b * fmb_i

        dzf_r = -kf * zf_r + kb * zb_r
        dzf_i = -kf * zf_i + kb * zb_i
        dzb_r = -kb * zb_r + kf * zf_r
        dzb_i = -kb * zb_i + kf * zf_i
        nzf_r = E1f * zf_r + rfw + dzf_r * trs
        nzf_i = E1f * zf_i + dzf_i * trs
        nzb_r = E1b * zb_r + rbw + dzb_r * trs
        nzb_i = E1b * zb_i + dzb_i * trs
        zf_r, zf_i, zb_r, zb_i = nzf_r, nzf_i, nzb_r, nzb_i

        # ---- B0 precession (both pools): Fp *= e^{+i phi}, Fm *= e^{-i phi} ----
        fpf_r, fpf_i = fpf_r * cph - fpf_i * sph, fpf_r * sph + fpf_i * cph
        fmf_r, fmf_i = fmf_r * cph + fmf_i * sph, fmf_i * cph - fmf_r * sph
        fpb_r, fpb_i = fpb_r * cph - fpb_i * sph, fpb_r * sph + fpb_i * cph
        fmb_r, fmb_i = fmb_r * cph + fmb_i * sph, fmb_i * cph - fmb_r * sph

        # ---- RF pulse (free pool only); trig precomputed on host, read from SMEM ----
        c = ca_ref[p]; s = sa_ref[p]; cb = cb_ref[p]; sb = sb_ref[p]
        c2 = c * c; s2 = s * s; cs = c * s
        eb2_r = cb * cb - sb * sb          # (e^{i b})^2
        eb2_i = 2.0 * cb * sb

        # conj(Fm) * e^{+2ib}
        t1_r = fmf_r * eb2_r + fmf_i * eb2_i
        t1_i = fmf_r * eb2_i - fmf_i * eb2_r
        # Z * e^{+ib}
        ze_r = zf_r * cb - zf_i * sb
        ze_i = zf_r * sb + zf_i * cb
        fp_new_r = c2 * fpf_r + s2 * t1_r - cs * ze_i
        fp_new_i = c2 * fpf_i + s2 * t1_i + cs * ze_r

        # conj(Fp) * e^{-2ib}
        t2_r = fpf_r * eb2_r - fpf_i * eb2_i
        t2_i = -fpf_r * eb2_i - fpf_i * eb2_r
        # Z * e^{-ib}
        zm_r = zf_r * cb + zf_i * sb
        zm_i = zf_i * cb - zf_r * sb
        fm_new_r = s2 * t2_r + c2 * fmf_r + cs * zm_i
        fm_new_i = s2 * t2_i + c2 * fmf_i - cs * zm_r

        # -1j*s*c*(Fp e^{-ib} - Fm e^{+ib}) + (c^2 - s^2) Z
        pe_r = fpf_r * cb + fpf_i * sb
        pe_i = fpf_i * cb - fpf_r * sb
        me_r = fmf_r * cb - fmf_i * sb
        me_i = fmf_r * sb + fmf_i * cb
        d_r = pe_r - me_r
        d_i = pe_i - me_i
        z_new_r = cs * d_i + (c2 - s2) * zf_r
        z_new_i = -cs * d_r + (c2 - s2) * zf_i

        fpf_r, fpf_i = fp_new_r, fp_new_i
        fmf_r, fmf_i = fm_new_r, fm_new_i
        zf_r, zf_i = z_new_r, z_new_i

        # ---- EPG gradient shift: XLU lane rotate + boundary/pad masks (exact) ----
        # roll is circular, so the masks are required to kill the wrap-around lanes.
        fpf_r = jnp.where(fp_keep, pltpu.roll(fpf_r, 1, axis=1), 0.0)
        fpf_i = jnp.where(fp_keep, pltpu.roll(fpf_i, 1, axis=1), 0.0)
        fpb_r = jnp.where(fp_keep, pltpu.roll(fpb_r, 1, axis=1), 0.0)
        fpb_i = jnp.where(fp_keep, pltpu.roll(fpb_i, 1, axis=1), 0.0)
        fmf_r = jnp.where(fm_keep, pltpu.roll(fmf_r, LANES - 1, axis=1), 0.0)
        fmf_i = jnp.where(fm_keep, pltpu.roll(fmf_i, LANES - 1, axis=1), 0.0)
        fmb_r = jnp.where(fm_keep, pltpu.roll(fmb_r, LANES - 1, axis=1), 0.0)
        fmb_i = jnp.where(fm_keep, pltpu.roll(fmb_i, LANES - 1, axis=1), 0.0)

        # ---- record post-pulse state: a single (12,128) slab store ----
        slab = jnp.concatenate(
            [fpf_r, fpf_i, fpb_r, fpb_i, fmf_r, fmf_i, fmb_r, fmb_i,
             zf_r, zf_i, zb_r, zb_i], axis=0)
        out_ref[j, :, :] = slab

        return (fpf_r, fpf_i, fpb_r, fpb_i, fmf_r, fmf_i, fmb_r, fmb_i,
                zf_r, zf_i, zb_r, zb_i)

    carry = jax.lax.fori_loop(0, chunk, body, carry0)

    # ---- write carried state back to scratch for the next grid step ----
    (fpf_r, fpf_i, fpb_r, fpb_i, fmf_r, fmf_i, fmb_r, fmb_i,
     zf_r, zf_i, zb_r, zb_i) = carry
    st[0:ROWS, :] = jnp.concatenate(
        [fpf_r, fpf_i, fpb_r, fpb_i, fmf_r, fmf_i, fmb_r, fmb_i,
         zf_r, zf_i, zb_r, zb_i], axis=0)


def epg_simulation_mt(flip_angles, phases, T1f, T2f, T1b, T2b, kf, kb, TR, TE,
                      B0=0.0, B1=1.0, wf=1.0, wb=0.1, n_states=21, chunk=32):
    assert n_states <= LANES
    N = int(flip_angles.shape[0])
    chunk = int(min(chunk, max(N, 1)))          # keep CHUNK*6 KiB well under VMEM (v7x safe)
    n_chunks = -(-N // chunk)
    Npad = n_chunks * chunk

    flip = jnp.asarray(flip_angles, jnp.float32)
    ph = jnp.asarray(phases, jnp.float32)
    if Npad != N:
        flip = jnp.pad(flip, (0, Npad - N))     # padded pulses: flip=0, phase=0 (outputs discarded)
        ph = jnp.pad(ph, (0, Npad - N))

    # per-pulse RF trig precomputed outside the kernel
    alpha_half = 0.5 * flip * jnp.float32(B1)
    ca = jnp.cos(alpha_half)
    sa = jnp.sin(alpha_half)
    cb = jnp.cos(ph)
    sb = jnp.sin(ph)

    # loop-invariant scalars precomputed on host
    E1f = math.exp(-TR / T1f); E2f = math.exp(-TR / T2f)
    E1b = math.exp(-TR / T1b); E2b = math.exp(-TR / T2b)
    phi = 2.0 * math.pi * B0 * TR / 1000.0
    prm = jnp.array([E1f, E2f, E1b, E2b, kf, kb, TR / 1000.0,
                     math.cos(phi), math.sin(phi), wf, wb,
                     (1.0 - E1f) * wf, (1.0 - E1b) * wb, 0.0, 0.0, 0.0],
                    dtype=jnp.float32)

    out = pl.pallas_call(
        partial(_epg_mt_kernel, chunk=chunk, n_states=n_states),
        out_shape=jax.ShapeDtypeStruct((Npad, ROWS, LANES), jnp.float32),
        grid_spec=pltpu.PrefetchScalarGridSpec(
            num_scalar_prefetch=5,
            grid=(n_chunks,),
            in_specs=[],
            out_specs=pl.BlockSpec((chunk, ROWS, LANES), lambda c, *_: (c, 0, 0)),
            scratch_shapes=[pltpu.VMEM((SROWS, LANES), jnp.float32)],
        ),
        compiler_params=pltpu.CompilerParams(dimension_semantics=("arbitrary",)),
    )(ca, sa, cb, sb, prm)

    ns = n_states
    out = out[:N]
    Fp_f = (out[:, 0, :ns] + 1j * out[:, 1, :ns]).astype(jnp.complex64)
    Fp_b = (out[:, 2, :ns] + 1j * out[:, 3, :ns]).astype(jnp.complex64)
    Fm_f = (out[:, 4, :ns] + 1j * out[:, 5, :ns]).astype(jnp.complex64)
    Fm_b = (out[:, 6, :ns] + 1j * out[:, 7, :ns]).astype(jnp.complex64)
    Z_f = (out[:, 8, :ns] + 1j * out[:, 9, :ns]).astype(jnp.complex64)
    Z_b = (out[:, 10, :ns] + 1j * out[:, 11, :ns]).astype(jnp.complex64)
    # same return convention as the torch module: list of per-step tuples
    return [(Fp_f[i], Fm_f[i], Z_f[i], Fp_b[i], Fm_b[i], Z_b[i]) for i in range(N)]


# ------------------------- pure-JAX reference (for verification) -------------------------
def epg_simulation_mt_ref(flip, phases, T1f, T2f, T1b, T2b, kf, kb, TR, TE,
                          B0=0.0, B1=1.0, wf=1.0, wb=0.1, n_states=21):
    cf = jnp.complex64
    Fp_f = jnp.zeros(n_states, cf); Fm_f = jnp.zeros(n_states, cf)
    Z_f = jnp.zeros(n_states, cf).at[0].set(wf)
    Fp_b = jnp.zeros(n_states, cf); Fm_b = jnp.zeros(n_states, cf)
    Z_b = jnp.zeros(n_states, cf).at[0].set(wb)
    E1f = jnp.exp(-jnp.float32(TR / T1f)); E2f = jnp.exp(-jnp.float32(TR / T2f))
    E1b = jnp.exp(-jnp.float32(TR / T1b)); E2b = jnp.exp(-jnp.float32(TR / T2b))
    phi = jnp.float32(2.0 * math.pi * B0 * TR / 1000.0)
    states = []
    for i in range(flip.shape[0]):
        Fp_f = E2f * Fp_f; Fm_f = E2f * Fm_f
        Fp_b = E2b * Fp_b; Fm_b = E2b * Fm_b
        dZf = -kf * Z_f + kb * Z_b
        dZb = -kb * Z_b + kf * Z_f
        Z_f = E1f * Z_f + (1 - E1f) * wf + dZf * TR / 1000.0
        Z_b = E1b * Z_b + (1 - E1b) * wb + dZb * TR / 1000.0
        Fp_f = Fp_f * jnp.exp(1j * phi); Fm_f = Fm_f * jnp.exp(-1j * phi)
        Fp_b = Fp_b * jnp.exp(1j * phi); Fm_b = Fm_b * jnp.exp(-1j * phi)
        alpha = flip[i] * B1; beta = phases[i]
        ca = jnp.cos(alpha / 2); sa = jnp.sin(alpha / 2)
        eib = jnp.exp(1j * beta); emib = jnp.exp(-1j * beta)
        Fp_new = ca**2 * Fp_f + sa**2 * jnp.conj(Fm_f) * eib**2 + 1j * ca * sa * (Z_f * eib)
        Fm_new = sa**2 * jnp.conj(Fp_f) * emib**2 + ca**2 * Fm_f - 1j * ca * sa * (Z_f * emib)
        Z_new = -1j * sa * ca * (Fp_f * emib - Fm_f * eib) + (ca**2 - sa**2) * Z_f
        Fp_f, Fm_f, Z_f = Fp_new, Fm_new, Z_new
        Fp_f = jnp.roll(Fp_f, 1).at[0].set(0)
        Fm_f = jnp.roll(Fm_f, -1).at[-1].set(0)
        Fp_b = jnp.roll(Fp_b, 1).at[0].set(0)
        Fm_b = jnp.roll(Fm_b, -1).at[-1].set(0)
        states.append((Fp_f, Fm_f, Z_f, Fp_b, Fm_b, Z_b))
    return states


if __name__ == "__main__":
    key = jax.random.PRNGKey(0)
    k1, k2 = jax.random.split(key)
    N = 8
    n_states = 21
    flip_angles = jax.random.uniform(k1, (N,), minval=0.1, maxval=math.pi / 2).astype(jnp.float32)
    phases = jax.random.uniform(k2, (N,), minval=0.0, maxval=2.0 * math.pi).astype(jnp.float32)

    T1f, T2f = 1000.0, 80.0
    T1b, T2b = 1000.0, 10.0
    kf, kb = 3.0, 9.0
    TR, TE = 30.0, 15.0
    B0, B1 = 10.0, 0.95
    wf, wb = 0.9, 0.1

    states = epg_simulation_mt(flip_angles, phases, T1f, T2f, T1b, T2b, kf, kb,
                               TR, TE, B0, B1, wf, wb, n_states=n_states)
    jax.block_until_ready(states)

    ref_states = epg_simulation_mt_ref(flip_angles, phases, T1f, T2f, T1b, T2b, kf, kb,
                                       TR, TE, B0, B1, wf, wb, n_states=n_states)
    for step, (got, ref) in enumerate(zip(states, ref_states)):
        for g, r in zip(got, ref):
            np.testing.assert_allclose(np.asarray(g), np.asarray(r), atol=1e-4, rtol=1e-3)

    print("KERNEL_OK")
</pallas_src>

<mosaic_0001>
module attributes {stable_mosaic.version = 11 : i64} {
  func.func @_epg_mt_kernel(%arg0: i32, %arg1: memref<8xf32, #tpu.memory_space<smem>>, %arg2: memref<8xf32, #tpu.memory_space<smem>>, %arg3: memref<8xf32, #tpu.memory_space<smem>>, %arg4: memref<8xf32, #tpu.memory_space<smem>>, %arg5: memref<16xf32, #tpu.memory_space<smem>>, %arg6: memref<8x12x128xf32, #tpu.memory_space<vmem>>, %arg7: memref<16x128xf32, #tpu.memory_space<vmem>>) attributes {dimension_semantics = [#tpu.dimension_semantics<arbitrary>], iteration_bounds = array<i64: 1>, scalar_prefetch = 5 : i64, scratch_operands = 1 : i64, tpu.core_type = #tpu.core_type<tc>, window_params = [{transform_indices = @transform_0, window_bounds = array<i64: 8, 12, 128>}]} {
    %c0 = arith.constant 0 : index
    %0 = memref.load %arg5[%c0] : memref<16xf32, #tpu.memory_space<smem>>
    %c1 = arith.constant 1 : index
    %1 = memref.load %arg5[%c1] : memref<16xf32, #tpu.memory_space<smem>>
    %c2 = arith.constant 2 : index
    %2 = memref.load %arg5[%c2] : memref<16xf32, #tpu.memory_space<smem>>
    %c3 = arith.constant 3 : index
    %3 = memref.load %arg5[%c3] : memref<16xf32, #tpu.memory_space<smem>>
    %c4 = arith.constant 4 : index
    %4 = memref.load %arg5[%c4] : memref<16xf32, #tpu.memory_space<smem>>
    %c5 = arith.constant 5 : index
    %5 = memref.load %arg5[%c5] : memref<16xf32, #tpu.memory_space<smem>>
    %c6 = arith.constant 6 : index
    %6 = memref.load %arg5[%c6] : memref<16xf32, #tpu.memory_space<smem>>
    %c7 = arith.constant 7 : index
    %7 = memref.load %arg5[%c7] : memref<16xf32, #tpu.memory_space<smem>>
    %c8 = arith.constant 8 : index
    %8 = memref.load %arg5[%c8] : memref<16xf32, #tpu.memory_space<smem>>
    %c9 = arith.constant 9 : index
    %9 = memref.load %arg5[%c9] : memref<16xf32, #tpu.memory_space<smem>>
    %c10 = arith.constant 10 : index
    %10 = memref.load %arg5[%c10] : memref<16xf32, #tpu.memory_space<smem>>
    %c11 = arith.constant 11 : index
    %11 = memref.load %arg5[%c11] : memref<16xf32, #tpu.memory_space<smem>>
    %c12 = arith.constant 12 : index
    %12 = memref.load %arg5[%c12] : memref<16xf32, #tpu.memory_space<smem>>
    %13 = tpu.iota {dimensions = array<i32: 1>} : vector<1x128xi32>
    %c1_i32 = arith.constant 1 : i32
    %14 = vector.broadcast %c1_i32 : i32 to vector<1x128xi32>
    %15 = arith.cmpi sge, %13, %14 : vector<1x128xi32>
    %c21_i32 = arith.constant 21 : i32
    %16 = vector.broadcast %c21_i32 : i32 to vector<1x128xi32>
    %17 = arith.cmpi slt, %13, %16 : vector<1x128xi32>
    %18 = arith.andi %15, %17 : vector<1x128xi1>
    %c20_i32 = arith.constant 20 : i32
    %19 = vector.broadcast %c20_i32 : i32 to vector<1x128xi32>
    %20 = arith.cmpi slt, %13, %19 : vector<1x128xi32>
    %c0_i32 = arith.constant 0 : i32
    %21 = arith.cmpi eq, %arg0, %c0_i32 : i32
    %22 = arith.extui %21 : i1 to i32
    %c0_i32_0 = arith.constant 0 : i32
    %23 = arith.cmpi ne, %22, %c0_i32_0 : i32
    scf.if %23 {
      %40 = tpu.iota {dimensions = array<i32: 0>} : vector<16x128xi32>
      %41 = tpu.iota {dimensions = array<i32: 1>} : vector<16x128xi32>
      %c8_i32_30 = arith.constant 8 : i32
      %42 = vector.broadcast %c8_i32_30 : i32 to vector<16x128xi32>
      %43 = arith.cmpi eq, %40, %42 : vector<16x128xi32>
      %c0_i32_31 = arith.constant 0 : i32
      %44 = vector.broadcast %c0_i32_31 : i32 to vector<16x128xi32>
      %45 = arith.cmpi eq, %41, %44 : vector<16x128xi32>
      %46 = arith.andi %43, %45 : vector<16x128xi1>
      %c10_i32 = arith.constant 10 : i32
      %47 = vector.broadcast %c10_i32 : i32 to vector<16x128xi32>
      %48 = arith.cmpi eq, %40, %47 : vector<16x128xi32>
      %c0_i32_32 = arith.constant 0 : i32
      %49 = vector.broadcast %c0_i32_32 : i32 to vector<16x128xi32>
      %50 = arith.cmpi eq, %41, %49 : vector<16x128xi32>
      %51 = arith.andi %48, %50 : vector<16x128xi1>
      %cst = arith.constant 0.000000e+00 : f32
      %52 = vector.broadcast %10 : f32 to vector<16x128xf32>
      %53 = vector.broadcast %cst : f32 to vector<16x128xf32>
      %54 = arith.select %51, %52, %53 : vector<16x128xi1>, vector<16x128xf32>
      %55 = vector.broadcast %9 : f32 to vector<16x128xf32>
      %56 = arith.select %46, %55, %54 : vector<16x128xi1>, vector<16x128xf32>
      %c0_33 = arith.constant 0 : index
      %c0_34 = arith.constant 0 : index
      %57 = vector.load %arg7[%c0_33, %c0_34] : memref<16x128xf32, #tpu.memory_space<vmem>>, vector<16x128xf32>
      tpu.vector_store %arg7[%c0_33, %c0_34], %56 {strides = array<i32>} : memref<16x128xf32, #tpu.memory_space<vmem>>, vector<16x128xf32>,
    } else {
    }
    %c0_1 = arith.constant 0 : index
    %c0_2 = arith.constant 0 : index
    %24 = vector.load %arg7[%c0_1, %c0_2] : memref<16x128xf32, #tpu.memory_space<vmem>>, vector<1x128xf32>
    %c1_3 = arith.constant 1 : index
    %c0_4 = arith.constant 0 : index
    %25 = vector.load %arg7[%c1_3, %c0_4] : memref<16x128xf32, #tpu.memory_space<vmem>>, vector<1x128xf32>
    %c2_5 = arith.constant 2 : index
    %c0_6 = arith.constant 0 : index
    %26 = vector.load %arg7[%c2_5, %c0_6] : memref<16x128xf32, #tpu.memory_space<vmem>>, vector<1x128xf32>
    %c3_7 = arith.constant 3 : index
    %c0_8 = arith.constant 0 : index
    %27 = vector.load %arg7[%c3_7, %c0_8] : memref<16x128xf32, #tpu.memory_space<vmem>>, vector<1x128xf32>
    %c4_9 = arith.constant 4 : index
    %c0_10 = arith.constant 0 : index
    %28 = vector.load %arg7[%c4_9, %c0_10] : memref<16x128xf32, #tpu.memory_space<vmem>>, vector<1x128xf32>
    %c5_11 = arith.constant 5 : index
    %c0_12 = arith.constant 0 : index
    %29 = vector.load %arg7[%c5_11, %c0_12] : memref<16x128xf32, #tpu.memory_space<vmem>>, vector<1x128xf32>
    %c6_13 = arith.constant 6 : index
    %c0_14 = arith.constant 0 : index
    %30 = vector.load %arg7[%c6_13, %c0_14] : memref<16x128xf32, #tpu.memory_space<vmem>>, vector<1x128xf32>
    %c7_15 = arith.constant 7 : index
    %c0_16 = arith.constant 0 : index
    %31 = vector.load %arg7[%c7_15, %c0_16] : memref<16x128xf32, #tpu.memory_space<vmem>>, vector<1x128xf32>
    %c8_17 = arith.constant 8 : index
    %c0_18 = arith.constant 0 : index
    %32 = vector.load %arg7[%c8_17, %c0_18] : memref<16x128xf32, #tpu.memory_space<vmem>>, vector<1x128xf32>
    %c9_19 = arith.constant 9 : index
    %c0_20 = arith.constant 0 : index
    %33 = vector.load %arg7[%c9_19, %c0_20] : memref<16x128xf32, #tpu.memory_space<vmem>>, vector<1x128xf32>
    %c10_21 = arith.constant 10 : index
    %c0_22 = arith.constant 0 : index
    %34 = vector.load %arg7[%c10_21, %c0_22] : memref<16x128xf32, #tpu.memory_space<vmem>>, vector<1x128xf32>
    %c11_23 = arith.constant 11 : index
    %c0_24 = arith.constant 0 : index
    %35 = vector.load %arg7[%c11_23, %c0_24] : memref<16x128xf32, #tpu.memory_space<vmem>>, vector<1x128xf32>
    %c0_i32_25 = arith.constant 0 : i32
    %c8_i32 = arith.constant 8 : i32
    %36 = arith.addi %c0_i32_25, %c8_i32 : i32
    %c1_i32_26 = arith.constant 1 : i32
    %37:12 = scf.for %arg8 = %c0_i32_25 to %36 step %c1_i32_26 iter_args(%arg9 = %24, %arg10 = %25, %arg11 = %26, %arg12 = %27, %arg13 = %28, %arg14 = %29, %arg15 = %30, %arg16 = %31, %arg17 = %32, %arg18 = %33, %arg19 = %34, %arg20 = %35) -> (vector<1x128xf32>, vector<1x128xf32>, vector<1x128xf32>, vector<1x128xf32>, vector<1x128xf32>, vector<1x128xf32>, vector<1x128xf32>, vector<1x128xf32>, vector<1x128xf32>, vector<1x128xf32>, vector<1x128xf32>, vector<1x128xf32>)  : i32 {
      %c8_i32_30 = arith.constant 8 : i32
      %40 = arith.muli %arg0, %c8_i32_30 : i32
      %41 = arith.addi %40, %arg8 : i32
      %42 = vector.broadcast %1 : f32 to vector<1x128xf32>
      %43 = arith.mulf %42, %arg9 : vector<1x128xf32>
      %44 = vector.broadcast %1 : f32 to vector<1x128xf32>
      %45 = arith.mulf %44, %arg10 : vector<1x128xf32>
      %46 = vector.broadcast %1 : f32 to vector<1x128xf32>
      %47 = arith.mulf %46, %arg13 : vector<1x128xf32>
      %48 = vector.broadcast %1 : f32 to vector<1x128xf32>
      %49 = arith.mulf %48, %arg14 : vector<1x128xf32>
      %50 = vector.broadcast %3 : f32 to vector<1x128xf32>
      %51 = arith.mulf %50, %arg11 : vector<1x128xf32>
      %52 = vector.broadcast %3 : f32 to vector<1x128xf32>
      %53 = arith.mulf %52, %arg12 : vector<1x128xf32>
      %54 = vector.broadcast %3 : f32 to vector<1x128xf32>
      %55 = arith.mulf %54, %arg15 : vector<1x128xf32>
      %56 = vector.broadcast %3 : f32 to vector<1x128xf32>
      %57 = arith.mulf %56, %arg16 : vector<1x128xf32>
      %cst = arith.constant 0.000000e+00 : f32
      %58 = arith.subf %cst, %4 : f32
      %59 = vector.broadcast %58 : f32 to vector<1x128xf32>
      %60 = arith.mulf %59, %arg17 : vector<1x128xf32>
      %61 = vector.broadcast %5 : f32 to vector<1x128xf32>
      %62 = arith.mulf %61, %arg19 : vector<1x128xf32>
      %63 = arith.addf %60, %62 : vector<1x128xf32>
      %cst_31 = arith.constant 0.000000e+00 : f32
      %64 = arith.subf %cst_31, %4 : f32
      %65 = vector.broadcast %64 : f32 to vector<1x128xf32>
      %66 = arith.mulf %65, %arg18 : vector<1x128xf32>
      %67 = vector.broadcast %5 : f32 to vector<1x128xf32>
      %68 = arith.mulf %67, %arg20 : vector<1x128xf32>
      %69 = arith.addf %66, %68 : vector<1x128xf32>
      %cst_32 = arith.constant 0.000000e+00 : f32
      %70 = arith.subf %cst_32, %5 : f32
      %71 = vector.broadcast %70 : f32 to vector<1x128xf32>
      %72 = arith.mulf %71, %arg19 : vector<1x128xf32>
      %73 = vector.broadcast %4 : f32 to vector<1x128xf32>
      %74 = arith.mulf %73, %arg17 : vector<1x128xf32>
      %75 = arith.addf %72, %74 : vector<1x128xf32>
      %cst_33 = arith.constant 0.000000e+00 : f32
      %76 = arith.subf %cst_33, %5 : f32
      %77 = vector.broadcast %76 : f32 to vector<1x128xf32>
      %78 = arith.mulf %77, %arg20 : vector<1x128xf32>
      %79 = vector.broadcast %4 : f32 to vector<1x128xf32>
      %80 = arith.mulf %79, %arg18 : vector<1x128xf32>
      %81 = arith.addf %78, %80 : vector<1x128xf32>
      %82 = vector.broadcast %0 : f32 to vector<1x128xf32>
      %83 = arith.mulf %82, %arg17 : vector<1x128xf32>
      %84 = vector.broadcast %11 : f32 to vector<1x128xf32>
      %85 = arith.addf %83, %84 : vector<1x128xf32>
      %86 = vector.broadcast %6 : f32 to vector<1x128xf32>
      %87 = arith.mulf %63, %86 : vector<1x128xf32>
      %88 = arith.addf %85, %87 : vector<1x128xf32>
      %89 = vector.broadcast %0 : f32 to vector<1x128xf32>
      %90 = arith.mulf %89, %arg18 : vector<1x128xf32>
      %91 = vector.broadcast %6 : f32 to vector<1x128xf32>
      %92 = arith.mulf %69, %91 : vector<1x128xf32>
      %93 = arith.addf %90, %92 : vector<1x128xf32>
      %94 = vector.broadcast %2 : f32 to vector<1x128xf32>
      %95 = arith.mulf %94, %arg19 : vector<1x128xf32>
      %96 = vector.broadcast %12 : f32 to vector<1x128xf32>
      %97 = arith.addf %95, %96 : vector<1x128xf32>
      %98 = vector.broadcast %6 : f32 to vector<1x128xf32>
      %99 = arith.mulf %75, %98 : vector<1x128xf32>
      %100 = arith.addf %97, %99 : vector<1x128xf32>
      %101 = vector.broadcast %2 : f32 to vector<1x128xf32>
      %102 = arith.mulf %101, %arg20 : vector<1x128xf32>
      %103 = vector.broadcast %6 : f32 to vector<1x128xf32>
      %104 = arith.mulf %81, %103 : vector<1x128xf32>
      %105 = arith.addf %102, %104 : vector<1x128xf32>
      %106 = vector.broadcast %7 : f32 to vector<1x128xf32>
      %107 = arith.mulf %43, %106 : vector<1x128xf32>
      %108 = vector.broadcast %8 : f32 to vector<1x128xf32>
      %109 = arith.mulf %45, %108 : vector<1x128xf32>
      %110 = arith.subf %107, %109 : vector<1x128xf32>
      %111 = vector.broadcast %8 : f32 to vector<1x128xf32>
      %112 = arith.mulf %43, %111 : vector<1x128xf32>
      %113 = vector.broadcast %7 : f32 to vector<1x128xf32>
      %114 = arith.mulf %45, %113 : vector<1x128xf32>
      %115 = arith.addf %112, %114 : vector<1x128xf32>
      %116 = vector.broadcast %7 : f32 to vector<1x128xf32>
      %117 = arith.mulf %47, %116 : vector<1x128xf32>
      %118 = vector.broadcast %8 : f32 to vector<1x128xf32>
      %119 = arith.mulf %49, %118 : vector<1x128xf32>
      %120 = arith.addf %117, %119 : vector<1x128xf32>
      %121 = vector.broadcast %7 : f32 to vector<1x128xf32>
      %122 = arith.mulf %49, %121 : vector<1x128xf32>
      %123 = vector.broadcast %8 : f32 to vector<1x128xf32>
      %124 = arith.mulf %47, %123 : vector<1x128xf32>
      %125 = arith.subf %122, %124 : vector<1x128xf32>
      %126 = vector.broadcast %7 : f32 to vector<1x128xf32>
      %127 = arith.mulf %51, %126 : vector<1x128xf32>
      %128 = vector.broadcast %8 : f32 to vector<1x128xf32>
      %129 = arith.mulf %53, %128 : vector<1x128xf32>
      %130 = arith.subf %127, %129 : vector<1x128xf32>
      %131 = vector.broadcast %8 : f32 to vector<1x128xf32>
      %132 = arith.mulf %51, %131 : vector<1x128xf32>
      %133 = vector.broadcast %7 : f32 to vector<1x128xf32>
      %134 = arith.mulf %53, %133 : vector<1x128xf32>
      %135 = arith.addf %132, %134 : vector<1x128xf32>
      %136 = vector.broadcast %7 : f32 to vector<1x128xf32>
      %137 = arith.mulf %55, %136 : vector<1x128xf32>
      %138 = vector.broadcast %8 : f32 to vector<1x128xf32>
      %139 = arith.mulf %57, %138 : vector<1x128xf32>
      %140 = arith.addf %137, %139 : vector<1x128xf32>
      %141 = vector.broadcast %7 : f32 to vector<1x128xf32>
      %142 = arith.mulf %57, %141 : vector<1x128xf32>
      %143 = vector.broadcast %8 : f32 to vector<1x128xf32>
      %144 = arith.mulf %55, %143 : vector<1x128xf32>
      %145 = arith.subf %142, %144 : vector<1x128xf32>
      %146 = arith.index_cast %41 : i32 to index
      %147 = memref.load %arg1[%146] : memref<8xf32, #tpu.memory_space<smem>>
      %148 = arith.index_cast %41 : i32 to index
      %149 = memref.load %arg2[%148] : memref<8xf32, #tpu.memory_space<smem>>
      %150 = arith.index_cast %41 : i32 to index
      %151 = memref.load %arg3[%150] : memref<8xf32, #tpu.memory_space<smem>>
      %152 = arith.index_cast %41 : i32 to index
      %153 = memref.load %arg4[%152] : memref<8xf32, #tpu.memory_space<smem>>
      %154 = arith.mulf %147, %147 : f32
      %155 = arith.mulf %149, %149 : f32
      %156 = arith.mulf %147, %149 : f32
      %157 = arith.mulf %151, %151 : f32
      %158 = arith.mulf %153, %153 : f32
      %159 = arith.subf %157, %158 : f32
      %cst_34 = arith.constant 2.000000e+00 : f32
      %160 = arith.mulf %cst_34, %151 : f32
      %161 = arith.mulf %160, %153 : f32
      %162 = vector.broadcast %159 : f32 to vector<1x128xf32>
      %163 = arith.mulf %120, %162 : vector<1x128xf32>
      %164 = vector.broadcast %161 : f32 to vector<1x128xf32>
      %165 = arith.mulf %125, %164 : vector<1x128xf32>
      %166 = arith.addf %163, %165 : vector<1x128xf32>
      %167 = vector.broadcast %161 : f32 to vector<1x128xf32>
      %168 = arith.mulf %120, %167 : vector<1x128xf32>
      %169 = vector.broadcast %159 : f32 to vector<1x128xf32>
      %170 = arith.mulf %125, %169 : vector<1x128xf32>
      %171 = arith.subf %168, %170 : vector<1x128xf32>
      %172 = vector.broadcast %151 : f32 to vector<1x128xf32>
      %173 = arith.mulf %88, %172 : vector<1x128xf32>
      %174 = vector.broadcast %153 : f32 to vector<1x128xf32>
      %175 = arith.mulf %93, %174 : vector<1x128xf32>
      %176 = arith.subf %173, %175 : vector<1x128xf32>
      %177 = vector.broadcast %153 : f32 to vector<1x128xf32>
      %178 = arith.mulf %88, %177 : vector<1x128xf32>
      %179 = vector.broadcast %151 : f32 to vector<1x128xf32>
      %180 = arith.mulf %93, %179 : vector<1x128xf32>
      %181 = arith.addf %178, %180 : vector<1x128xf32>
      %182 = vector.broadcast %154 : f32 to vector<1x128xf32>
      %183 = arith.mulf %182, %110 : vector<1x128xf32>
      %184 = vector.broadcast %155 : f32 to vector<1x128xf32>
      %185 = arith.mulf %184, %166 : vector<1x128xf32>
      %186 = arith.addf %183, %185 : vector<1x128xf32>
      %187 = vector.broadcast %156 : f32 to vector<1x128xf32>
      %188 = arith.mulf %187, %181 : vector<1x128xf32>
      %189 = arith.subf %186, %188 : vector<1x128xf32>
      %190 = vector.broadcast %154 : f32 to vector<1x128xf32>
      %191 = arith.mulf %190, %115 : vector<1x128xf32>
      %192 = vector.broadcast %155 : f32 to vector<1x128xf32>
      %193 = arith.mulf %192, %171 : vector<1x128xf32>
      %194 = arith.addf %191, %193 : vector<1x128xf32>
      %195 = vector.broadcast %156 : f32 to vector<1x128xf32>
      %196 = arith.mulf %195, %176 : vector<1x128xf32>
      %197 = arith.addf %194, %196 : vector<1x128xf32>
      %198 = vector.broadcast %159 : f32 to vector<1x128xf32>
      %199 = arith.mulf %110, %198 : vector<1x128xf32>
      %200 = vector.broadcast %161 : f32 to vector<1x128xf32>
      %201 = arith.mulf %115, %200 : vector<1x128xf32>
      %202 = arith.subf %199, %201 : vector<1x128xf32>
      %cst_35 = arith.constant 0.000000e+00 : f32
      %203 = vector.broadcast %cst_35 : f32 to vector<1x128xf32>
      %204 = arith.subf %203, %110 : vector<1x128xf32>
      %205 = vector.broadcast %161 : f32 to vector<1x128xf32>
      %206 = arith.mulf %204, %205 : vector<1x128xf32>
      %207 = vector.broadcast %159 : f32 to vector<1x128xf32>
      %208 = arith.mulf %115, %207 : vector<1x128xf32>
      %209 = arith.subf %206, %208 : vector<1x128xf32>
      %210 = vector.broadcast %151 : f32 to vector<1x128xf32>
      %211 = arith.mulf %88, %210 : vector<1x128xf32>
      %212 = vector.broadcast %153 : f32 to vector<1x128xf32>
      %213 = arith.mulf %93, %212 : vector<1x128xf32>
      %214 = arith.addf %211, %213 : vector<1x128xf32>
      %215 = vector.broadcast %151 : f32 to vector<1x128xf32>
      %216 = arith.mulf %93, %215 : vector<1x128xf32>
      %217 = vector.broadcast %153 : f32 to vector<1x128xf32>
      %218 = arith.mulf %88, %217 : vector<1x128xf32>
      %219 = arith.subf %216, %218 : vector<1x128xf32>
      %220 = vector.broadcast %155 : f32 to vector<1x128xf32>
      %221 = arith.mulf %220, %202 : vector<1x128xf32>
      %222 = vector.broadcast %154 : f32 to vector<1x128xf32>
      %223 = arith.mulf %222, %120 : vector<1x128xf32>
      %224 = arith.addf %221, %223 : vector<1x128xf32>
      %225 = vector.broadcast %156 : f32 to vector<1x128xf32>
      %226 = arith.mulf %225, %219 : vector<1x128xf32>
      %227 = arith.addf %224, %226 : vector<1x128xf32>
      %228 = vector.broadcast %155 : f32 to vector<1x128xf32>
      %229 = arith.mulf %228, %209 : vector<1x128xf32>
      %230 = vector.broadcast %154 : f32 to vector<1x128xf32>
      %231 = arith.mulf %230, %125 : vector<1x128xf32>
      %232 = arith.addf %229, %231 : vector<1x128xf32>
      %233 = vector.broadcast %156 : f32 to vector<1x128xf32>
      %234 = arith.mulf %233, %214 : vector<1x128xf32>
      %235 = arith.subf %232, %234 : vector<1x128xf32>
      %236 = vector.broadcast %151 : f32 to vector<1x128xf32>
      %237 = arith.mulf %110, %236 : vector<1x128xf32>
      %238 = vector.broadcast %153 : f32 to vector<1x128xf32>
      %239 = arith.mulf %115, %238 : vector<1x128xf32>
      %240 = arith.addf %237, %239 : vector<1x128xf32>
      %241 = vector.broadcast %151 : f32 to vector<1x128xf32>
      %242 = arith.mulf %115, %241 : vector<1x128xf32>
      %243 = vector.broadcast %153 : f32 to vector<1x128xf32>
      %244 = arith.mulf %110, %243 : vector<1x128xf32>
      %245 = arith.subf %242, %244 : vector<1x128xf32>
      %246 = vector.broadcast %151 : f32 to vector<1x128xf32>
      %247 = arith.mulf %120, %246 : vector<1x128xf32>
      %248 = vector.broadcast %153 : f32 to vector<1x128xf32>
      %249 = arith.mulf %125, %248 : vector<1x128xf32>
      %250 = arith.subf %247, %249 : vector<1x128xf32>
      %251 = vector.broadcast %153 : f32 to vector<1x128xf32>
      %252 = arith.mulf %120, %251 : vector<1x128xf32>
      %253 = vector.broadcast %151 : f32 to vector<1x128xf32>
      %254 = arith.mulf %125, %253 : vector<1x128xf32>
      %255 = arith.addf %252, %254 : vector<1x128xf32>
      %256 = arith.subf %240, %250 : vector<1x128xf32>
      %257 = arith.subf %245, %255 : vector<1x128xf32>
      %258 = vector.broadcast %156 : f32 to vector<1x128xf32>
      %259 = arith.mulf %258, %257 : vector<1x128xf32>
      %260 = arith.subf %154, %155 : f32
      %261 = vector.broadcast %260 : f32 to vector<1x128xf32>
      %262 = arith.mulf %261, %88 : vector<1x128xf32>
      %263 = arith.addf %259, %262 : vector<1x128xf32>
      %cst_36 = arith.constant 0.000000e+00 : f32
      %264 = arith.subf %cst_36, %156 : f32
      %265 = vector.broadcast %264 : f32 to vector<1x128xf32>
      %266 = arith.mulf %265, %256 : vector<1x128xf32>
      %267 = arith.subf %154, %155 : f32
      %268 = vector.broadcast %267 : f32 to vector<1x128xf32>
      %269 = arith.mulf %268, %93 : vector<1x128xf32>
      %270 = arith.addf %266, %269 : vector<1x128xf32>
      %c1_i32_37 = arith.constant 1 : i32
      %271 = tpu.dynamic_rotate %189 by %c1_i32_37 dim 1 : vector<1x128xf32>, i32 -> vector<1x128xf32>
      %cst_38 = arith.constant 0.000000e+00 : f32
      %272 = vector.broadcast %cst_38 : f32 to vector<1x128xf32>
      %273 = arith.select %18, %271, %272 : vector<1x128xi1>, vector<1x128xf32>
      %c1_i32_39 = arith.constant 1 : i32
      %274 = tpu.dynamic_rotate %197 by %c1_i32_39 dim 1 : vector<1x128xf32>, i32 -> vector<1x128xf32>
      %cst_40 = arith.constant 0.000000e+00 : f32
      %275 = vector.broadcast %cst_40 : f32 to vector<1x128xf32>
      %276 = arith.select %18, %274, %275 : vector<1x128xi1>, vector<1x128xf32>
      %c1_i32_41 = arith.constant 1 : i32
      %277 = tpu.dynamic_rotate %130 by %c1_i32_41 dim 1 : vector<1x128xf32>, i32 -> vector<1x128xf32>
      %cst_42 = arith.constant 0.000000e+00 : f32
      %278 = vector.broadcast %cst_42 : f32 to vector<1x128xf32>
      %279 = arith.select %18, %277, %278 : vector<1x128xi1>, vector<1x128xf32>
      %c1_i32_43 = arith.constant 1 : i32
      %280 = tpu.dynamic_rotate %135 by %c1_i32_43 dim 1 : vector<1x128xf32>, i32 -> vector<1x128xf32>
      %cst_44 = arith.constant 0.000000e+00 : f32
      %281 = vector.broadcast %cst_44 : f32 to vector<1x128xf32>
      %282 = arith.select %18, %280, %281 : vector<1x128xi1>, vector<1x128xf32>
      %c127_i32 = arith.constant 127 : i32
      %283 = tpu.dynamic_rotate %227 by %c127_i32 dim 1 : vector<1x128xf32>, i32 -> vector<1x128xf32>
      %cst_45 = arith.constant 0.000000e+00 : f32
      %284 = vector.broadcast %cst_45 : f32 to vector<1x128xf32>
      %285 = arith.select %20, %283, %284 : vector<1x128xi1>, vector<1x128xf32>
      %c127_i32_46 = arith.constant 127 : i32
      %286 = tpu.dynamic_rotate %235 by %c127_i32_46 dim 1 : vector<1x128xf32>, i32 -> vector<1x128xf32>
      %cst_47 = arith.constant 0.000000e+00 : f32
      %287 = vector.broadcast %cst_47 : f32 to vector<1x128xf32>
      %288 = arith.select %20, %286, %287 : vector<1x128xi1>, vector<1x128xf32>
      %c127_i32_48 = arith.constant 127 : i32
      %289 = tpu.dynamic_rotate %140 by %c127_i32_48 dim 1 : vector<1x128xf32>, i32 -> vector<1x128xf32>
      %cst_49 = arith.constant 0.000000e+00 : f32
      %290 = vector.broadcast %cst_49 : f32 to vector<1x128xf32>
      %291 = arith.select %20, %289, %290 : vector<1x128xi1>, vector<1x128xf32>
      %c127_i32_50 = arith.constant 127 : i32
      %292 = tpu.dynamic_rotate %145 by %c127_i32_50 dim 1 : vector<1x128xf32>, i32 -> vector<1x128xf32>
      %cst_51 = arith.constant 0.000000e+00 : f32
      %293 = vector.broadcast %cst_51 : f32 to vector<1x128xf32>
      %294 = arith.select %20, %292, %293 : vector<1x128xi1>, vector<1x128xf32>
      %295 = tpu.concatenate %273, %276, %279, %282, %285, %288, %291, %294, %263, %270, %100, %105 in 0 : vector<1x128xf32>, vector<1x128xf32>, vector<1x128xf32>, vector<1x128xf32>, vector<1x128xf32>, vector<1x128xf32>, vector<1x128xf32>, vector<1x128xf32>, vector<1x128xf32>, vector<1x128xf32>, vector<1x128xf32>, vector<1x128xf32> -> vector<12x128xf32>
      %296 = arith.index_cast %arg8 : i32 to index
      %c0_52 = arith.constant 0 : index
      %c0_53 = arith.constant 0 : index
      %297 = vector.load %arg6[%296, %c0_52, %c0_53] : memref<8x12x128xf32, #tpu.memory_space<vmem>>, vector<1x12x128xf32>
      %298 = vector.shape_cast %297 : vector<1x12x128xf32> to vector<12x128xf32>
      %299 = vector.shape_cast %295 : vector<12x128xf32> to vector<1x12x128xf32>
      tpu.vector_store %arg6[%296, %c0_52, %c0_53], %299 {strides = array<i32>} : memref<8x12x128xf32, #tpu.memory_space<vmem>>, vector<1x12x128xf32>,
      scf.yield %273, %276, %279, %282, %285, %288, %291, %294, %263, %270, %100, %105 : vector<1x128xf32>, vector<1x128xf32>, vector<1x128xf32>, vector<1x128xf32>, vector<1x128xf32>, vector<1x128xf32>, vector<1x128xf32>, vector<1x128xf32>, vector<1x128xf32>, vector<1x128xf32>, vector<1x128xf32>, vector<1x128xf32>
    }
    %c8_i32_27 = arith.constant 8 : i32
    %38 = tpu.concatenate %37#0, %37#1, %37#2, %37#3, %37#4, %37#5, %37#6, %37#7, %37#8, %37#9, %37#10, %37#11 in 0 : vector<1x128xf32>, vector<1x128xf32>, vector<1x128xf32>, vector<1x128xf32>, vector<1x128xf32>, vector<1x128xf32>, vector<1x128xf32>, vector<1x128xf32>, vector<1x128xf32>, vector<1x128xf32>, vector<1x128xf32>, vector<1x128xf32> -> vector<12x128xf32>
    %c0_28 = arith.constant 0 : index
    %c0_29 = arith.constant 0 : index
    %39 = vector.load %arg7[%c0_28, %c0_29] : memref<16x128xf32, #tpu.memory_space<vmem>>, vector<12x128xf32>
    tpu.vector_store %arg7[%c0_28, %c0_29], %38 {strides = array<i32>} : memref<16x128xf32, #tpu.memory_space<vmem>>, vector<12x128xf32>,
    return
  }
  func.func @transform_0(%arg0: i32, %arg1: memref<8xf32, #tpu.memory_space<smem>>, %arg2: memref<8xf32, #tpu.memory_space<smem>>, %arg3: memref<8xf32, #tpu.memory_space<smem>>, %arg4: memref<8xf32, #tpu.memory_space<smem>>, %arg5: memref<16xf32, #tpu.memory_space<smem>>) -> (i32, i32, i32) {
    %c0_i32 = arith.constant 0 : i32
    %c0_i32_0 = arith.constant 0 : i32
    %c0_i32_1 = arith.constant 0 : i32
    return %arg0, %c0_i32, %c0_i32_0 : i32, i32, i32
  }
}

</mosaic_0001>

<bundles_post_ra>
// kernel: tpu_custom_call.1
= control target key start
LH: loop header
LB: loop body
LE: loop exit
PB: predicated region body
PF: predicated region fallthrough
CT: control target
= control target key end

     0   :  { %s1086_s0 = inlined_call_operand.hbm [shape: f32[8], index: 0, kind: input, shape index: {}]   ;;  %s1087_s5 = inlined_call_operand.vmem [shape: f32[8,12,128], index: 5, kind: output, shape index: {}]   ;;  %s1088_s1 = inlined_call_operand.vmem [shape: f32[8], index: 1, kind: input, shape index: {}]   ;;  %s1089_s2 = inlined_call_operand.vmem [shape: f32[8], index: 2, kind: input, shape index: {}]   ;;  %s1090_s3 = inlined_call_operand.vmem [shape: f32[8], index: 3, kind: input, shape index: {}]   ;;  %s1091_s4 = inlined_call_operand.vmem [shape: f32[16], index: 4, kind: input, shape index: {}]  }
   0x1   :  { %s558_s20 = scalar_lea.hbm %s1086_s0, 16 }
   0x2   :  { %p559_p0 = scmp.ne.s32.totalorder %s1086_s0, %s558_s20  ;;  %p562_p1 = scmp.lt.u32.totalorder %s558_s20, %s1086_s0 }
   0x4   :  { %p564_p2 = pnand %p562_p1, %p559_p0 }
   0x6   :  { %567 = shalt.err (!%p564_p2)  }
   0x7   :  { %s722_s25 = smov [#allocation4]   ;;  %s12_s30 = sshll.u32 %s1088_s1, 4  ;;  %s13_s30 = int_to_ptr.vmem [resolvable:$true] %s12_s30 }
   0x8   :  { %11 = dma.hbm_to_smem %s1086_s0, 16, %s722_s25, [#allocation3] }
   0x9   :  { %s16_s8 = sshll.u32 %s1089_s2, 4  ;;  %s568_s9 = scalar_lea.vmem %s13_s30, 16  ;;  %s17_s8 = int_to_ptr.vmem [resolvable:$true] %s16_s8 }
   0xa   :  { %p569_p3 = scmp.ne.s32.totalorder %s13_s30, %s568_s9  ;;  %p573_p4 = scmp.lt.s32.totalorder %s13_s30, %s13_s30 }
   0xb   :  { %p574_p5 = scmp.lt.s32.totalorder %s568_s9, %s568_s9 }
   0xd   :  { %p575_p6 = por %p574_p5, %p573_p4 }
   0xf   :  { %p576_p7 = pnand %p575_p6, %p569_p3 }
  0x11   :  { %579 = shalt.err (!%p576_p7)  }
  0x12   :  { %s723_s10 = smov [#allocation5]   ;;  %s20_s12 = sshll.u32 %s1090_s3, 4  ;;  %s21_s12 = int_to_ptr.vmem [resolvable:$true] %s20_s12 }
  0x13   :  { %15 = dma.vmem_to_smem %s13_s30, 16, %s723_s10, [#allocation3] }
  0x14   :  { %s580_s1 = scalar_lea.vmem %s17_s8, 16  ;;  %p585_p9 = scmp.lt.s32.totalorder %s17_s8, %s17_s8 }
  0x15   :  { %p581_p8 = scmp.ne.s32.totalorder %s17_s8, %s580_s1  ;;  %p586_p10 = scmp.lt.s32.totalorder %s580_s1, %s580_s1 }
  0x17   :  { %p587_p11 = por %p586_p10, %p585_p9 }
  0x19   :  { %p588_p12 = pnand %p587_p11, %p581_p8 }
  0x1b   :  { %591 = shalt.err (!%p588_p12)  }
  0x1c   :  { %s724_s2 = smov [#allocation6]   ;;  %s592_s13 = scalar_lea.vmem %s21_s12, 16 }
  0x1d   :  { %19 = dma.vmem_to_smem %s17_s8, 16, %s724_s2, [#allocation3] }
  0x1e   :  { %p593_p13 = scmp.ne.s32.totalorder %s21_s12, %s592_s13  ;;  %p597_p0 = scmp.lt.s32.totalorder %s21_s12, %s21_s12 }
  0x1f   :  { %p598_p1 = scmp.lt.s32.totalorder %s592_s13, %s592_s13 }
  0x21   :  { %p599_p2 = por %p598_p1, %p597_p0 }
  0x23   :  { %p600_p3 = pnand %p599_p2, %p593_p13 }
  0x25   :  { %603 = shalt.err (!%p600_p3)  }
  0x26   :  { %s725_s14 = smov [#allocation7]   ;;  %s24_s16 = sshll.u32 %s1091_s4, 4  ;;  %s25_s16 = int_to_ptr.vmem [resolvable:$true] %s24_s16 }
  0x27   :  { %23 = dma.vmem_to_smem %s21_s12, 16, %s725_s14, [#allocation3] }
  0x28   :  { %s604_s17 = scalar_lea.vmem %s25_s16, 16  ;;  %p609_p5 = scmp.lt.s32.totalorder %s25_s16, %s25_s16 }
  0x29   :  { %p605_p4 = scmp.ne.s32.totalorder %s25_s16, %s604_s17  ;;  %p610_p6 = scmp.lt.s32.totalorder %s604_s17, %s604_s17 }
  0x2b   :  { %p611_p7 = por %p610_p6, %p609_p5 }
  0x2d   :  { %p612_p8 = pnand %p611_p7, %p605_p4 }
  0x2f   :  { %615 = shalt.err (!%p612_p8)  }
  0x30   :  { %s726_s18 = smov [#allocation8]  }
  0x31   :  { %27 = dma.vmem_to_smem %s25_s16, 16, %s726_s18, [#allocation3] }
  0x32   :  { %668 = dma.done.wait [#allocation3], 80 }
  0x33   :  { %669 = vsyncadd [#allocation3], 4294967216 }
  0x34   :  { %29 = sfence }
  0x35   :  { %s784_s19 = sld [smem:[#allocation8]]  ;;  %s786_s20 = sld [smem:[#allocation8 + $0x1]]  ;;  %v43_v0 = vlaneseq  ;;  %v727_v1 = vmov 0.0  }
  0x36   :  { %s788_s21 = sld [smem:[#allocation8 + $0x2]]  ;;  %s790_s4 = sld [smem:[#allocation8 + $0x3]]  ;;  %71 = vst [vmem:[#allocation2] sm:$0xff] %v727_v1 }
  0x37   :  { %s792_s22 = sld [smem:[#allocation8 + $0x4]]  ;;  %s794_s23 = sld [smem:[#allocation8 + $0x5]]  ;;  %v796_v2 = vand.u32 127, %v43_v0  ;;  %v54_v3 = vshrl.u32 %v43_v0, 7 }
  0x38   :  { %s798_s24 = sld [smem:[#allocation8 + $0x6]]  ;;  %s800_s25 = sld [smem:[#allocation8 + $0x7]] }
  0x39   :  { %s802_s26 = sld [smem:[#allocation8 + $0x8]]  ;;  %s804_s27 = sld [smem:[#allocation8 + $0xb]]  ;;  %vm45_vm0 = vcmp.ge.s32.totalorder %v796_v2, 1  ;;  %vm46_vm1 = vcmp.lt.s32.totalorder %v796_v2, 21  ;;  %vm48_vm3 = vcmp.lt.s32.totalorder %v796_v2, 20  ;;  %v55_v5 = vadd.s32 8, %v54_v3 }
  0x3a   :  { %s808_s28 = sld [smem:[#allocation8 + $0xc]]  ;;  %s441_s29 = sld [smem:[#allocation8 + $0x9]]  ;;  %vm810_vm2 = vmand %vm45_vm0, %vm46_vm1  ;;  %vm58_vm5 = vcmp.eq.s32.totalorder %v796_v2, 0 }
  0x3b   :  { %s442_s30 = sld [smem:[#allocation8 + $0xa]]  ;;  %vm57_vm4 = vcmp.eq.s32.totalorder %v55_v5, 8  ;;  %vm62_vm6 = vcmp.eq.s32.totalorder %v55_v5, 10  ;;  %s840_s6 = smov 0  }
  0x3c   :  { %vm60_vm7 = vmand %vm57_vm4, %vm58_vm5 }
  0x3d   :  { %v73_v6 = vld [vmem:[#allocation2] sm:$0x1]   ;;  %v74_v7 = vld [vmem:[#allocation2 + $0x1] sm:$0x1]   ;;  %v75_v8 = vld [vmem:[#allocation2 + $0x2] sm:$0x1]  }
  0x3e   :  { %v76_v9 = vld [vmem:[#allocation2 + $0x3] sm:$0x1]   ;;  %v77_v10 = vld [vmem:[#allocation2 + $0x4] sm:$0x1]   ;;  %v78_v11 = vld [vmem:[#allocation2 + $0x5] sm:$0x1]  }
  0x3f   :  { %v79_v12 = vld [vmem:[#allocation2 + $0x6] sm:$0x1]   ;;  %v80_v13 = vld [vmem:[#allocation2 + $0x7] sm:$0x1]   ;;  %vm64_vm8 = vmand %vm62_vm6, %vm58_vm5 }
  0x40   :  { %v68_v14 = vstv %s441_s29 }
  0x41   :  { %v65_v15 = vstv %s442_s30 }
  0x42   :  { %v67_v16 = vsel %vm64_vm8, %v65_v15, 0.0 }
  0x43   :  { %v70_v17 = vsel %vm60_vm7, %v68_v14, %v67_v16 }
  0x44   :  { %72 = vst [vmem:[#allocation2 + $0x8] sm:$0xff] %v70_v17 }
  0x4b   :  { %v81_v18 = vld [vmem:[#allocation2 + $0x8] sm:$0x1]   ;;  %v82_v19 = vld [vmem:[#allocation2 + $0x9] sm:$0x1]   ;;  %v83_v20 = vld [vmem:[#allocation2 + $0xa] sm:$0x1]  }
  0x4c   :  { %v84_v21 = vld [vmem:[#allocation2 + $0xb] sm:$0x1]  }
  0x4d LB: > { %v870_v22 = vstv %s790_s4  ;;  %v873_v23 = vstv %s800_s25  ;;  %v876_v24 = vstv %s802_s26  ;;  %s881_s7 = sld [smem:[#allocation4 + %s720_s6]]  ;;  %s115_s10 = ssub.f32 0.0, %s792_s22  ;;  %v105_v33 = vstv %s786_s20  ;;  %s720_s6 = sphi %s840_s6, %s90_s6   ;;  %v716_v6 = vphi %v73_v6, %v264_v6   ;;  %v712_v7 = vphi %v74_v7, %v267_v7   ;;  %v708_v8 = vphi %v75_v8, %v270_v8   ;;  %v704_v9 = vphi %v76_v9, %v273_v9   ;;  %v700_v10 = vphi %v77_v10, %v276_v10   ;;  %v696_v11 = vphi %v78_v11, %v279_v11   ;;  %v692_v12 = vphi %v79_v12, %v282_v12   ;;  %v688_v13 = vphi %v80_v13, %v285_v13   ;;  %v684_v18 = vphi %v81_v18, %v256_v18   ;;  %v680_v19 = vphi %v82_v19, %v261_v19   ;;  %v676_v20 = vphi %v83_v20, %v1012_v20   ;;  %v672_v21 = vphi %v84_v21, %v151_v21  }
  0x4e   : > { %v111_v25 = vmul.f32 %v708_v8, %v870_v22  ;;  %v112_v26 = vmul.f32 %v704_v9, %v870_v22  ;;  %s179_s8 = sld [smem:[#allocation5 + %s720_s6]]  ;;  %s728_s11 = smov 1   ;;  %v106_v34 = vmul.f32 %v716_v6, %v105_v33  ;;  %v107_v35 = vmul.f32 %v712_v7, %v105_v33 }
  0x4f   : > { %s885_s9 = sld [smem:[#allocation6 + %s720_s6]]  ;;  %v108_v36 = vmul.f32 %v700_v10, %v105_v33  ;;  %v116_v37 = vstv %s115_s10  ;;  %v109_v38 = vmul.f32 %v696_v11, %v105_v33  ;;  %v118_v40 = vstv %s794_s23  ;;  %s124_s17 = ssub.f32 0.0, %s794_s23 }
  0x50   : > { %v166_v27 = vmul.f32 %v873_v23, %v111_v25  ;;  %v167_v28 = vmul.f32 %v876_v24, %v112_v26  ;;  %v169_v29 = vmul.f32 %v876_v24, %v111_v25  ;;  %v170_v30 = vmul.f32 %v873_v23, %v112_v26  ;;  %s893_s0 = sld [smem:[#allocation7 + %s720_s6]]  ;;  %s729_s29 = smov 127  }
  0x51   : > { %v117_v39 = vmul.f32 %v684_v18, %v116_v37  ;;  %v121_v41 = vmul.f32 %v680_v19, %v116_v37  ;;  %v119_v42 = vmul.f32 %v676_v20, %v118_v40  ;;  %v122_v43 = vmul.f32 %v672_v21, %v118_v40 }
  0x52   : > { %v168_v31 = vsub.f32 %v166_v27, %v167_v28  ;;  %v171_v32 = vadd.f32 %v170_v30, %v169_v29  ;;  %v133_v44 = vstv %s784_s19  ;;  %v135_v45 = vstv %s804_s27 }
  0x53   : > { %s900_s12 = smul.f32 %s881_s7, %s881_s7  ;;  %v134_v46 = vmul.f32 %v684_v18, %v133_v44  ;;  %v916_v47 = vstv %s798_s24  ;;  %v140_v48 = vmul.f32 %v680_v19, %v133_v44  ;;  %v157_v49 = vmul.f32 %v876_v24, %v106_v34 }
  0x54   : > { %268 = vrot.lane.b32.xlu0 %v168_v31, %s728_s11  ;;  %271 = vrot.lane.b32.xlu1 %v171_v32, %s728_s11  ;;  %s905_s1 = smul.f32 %s179_s8, %s179_s8  ;;  %v120_v50 = vadd.f32 %v119_v42, %v117_v39  ;;  %v123_v51 = vadd.f32 %v122_v43, %v121_v41  ;;  %v158_v52 = vmul.f32 %v873_v23, %v107_v35  ;;  %vm316_vm9 = vcmask 1040384  }
  0x55   : > { %s912_s2 = smul.f32 %s179_s8, %s881_s7  ;;  %v160_v53 = vmul.f32 %v873_v23, %v108_v36  ;;  %v136_v54 = vadd.f32 %v135_v45, %v134_v46  ;;  %v161_v55 = vmul.f32 %v876_v24, %v109_v38  ;;  %v163_v56 = vmul.f32 %v873_v23, %v109_v38  ;;  %s445_s7 = sshll.u32 %s720_s6, 4 }
  0x56   : > { %s185_s13 = smul.f32 %s885_s9, %s885_s9  ;;  %v164_v57 = vmul.f32 %v876_v24, %v108_v36  ;;  %v138_v58 = vmul.f32 %v916_v47, %v120_v50  ;;  %v141_v59 = vmul.f32 %v916_v47, %v123_v51  ;;  %v932_v60 = vadd.f32 %v158_v52, %v157_v49  ;;  %s253_s18 = ssub.f32 %s900_s12, %s905_s1 }
  0x57   : > { %s186_s14 = smul.f32 %s893_s0, %s893_s0  ;;  %v935_v61 = vstv %s885_s9  ;;  %v937_v62 = vadd.f32 %v161_v55, %v160_v53  ;;  %v943_v0 = vstv %s893_s0  ;;  %v206_v1 = vstv %s900_s12  ;;  %s257_s30 = ssub.f32 0.0, %s912_s2 }
  0x58   : > { %s188_s3 = smul.f32 2.0, %s885_s9  ;;  %v939_v63 = vsub.f32 %v163_v56, %v164_v57  ;;  %v946_v3 = vadd.f32 %v138_v58, %v136_v54  ;;  %v948_v5 = vadd.f32 %v141_v59, %v140_v48  ;;  %v208_v7 = vstv %s905_s1  ;;  %s1028_s10 = scalar_lea.vmem %s1087_s5, %s445_s7 }
  0x59   : > { %s187_s15 = ssub.f32 %s185_s13, %s186_s14  ;;  %v953_v10 = vstv %s912_s2  ;;  %v214_v11 = vmul.f32 %v206_v1, %v932_v60  ;;  %v153_v17 = vmul.f32 %v873_v23, %v106_v34  ;;  %v155_v25 = vmul.f32 %v876_v24, %v107_v35  ;;  %s90_s6 = sadd.s32 1, %s720_s6  }
  0x5a   : > { %s189_s16 = smul.f32 %s188_s3, %s893_s0  ;;  %v199_v15 = vmul.f32 %v935_v61, %v946_v3  ;;  %v201_v16 = vmul.f32 %v943_v0, %v948_v5  ;;  %v203_v28 = vmul.f32 %v943_v0, %v946_v3  ;;  %v204_v31 = vmul.f32 %v935_v61, %v948_v5  ;;  %p1053_p9 = scmp.ge.s32.totalorder %s90_s6, 8  }
  0x5b   : > { %v190_v6 = vstv %s187_s15  ;;  %v156_v33 = vsub.f32 %v153_v17, %v155_v25  ;;  %v229_v34 = vmul.f32 %v206_v1, %v937_v62  ;;  %v234_v53 = vmul.f32 %v206_v1, %v939_v63 }
  0x5c   : > { %v192_v8 = vstv %s189_s16  ;;  %v196_v9 = vmul.f32 %v190_v6, %v939_v63  ;;  %v191_v26 = vmul.f32 %v190_v6, %v937_v62  ;;  %v202_v30 = vsub.f32 %v199_v15, %v201_v16 }
  0x5d   : > { %v195_v14 = vmul.f32 %v192_v8, %v937_v62  ;;  %v193_v27 = vmul.f32 %v192_v8, %v939_v63  ;;  %v220_v32 = vmul.f32 %v192_v8, %v932_v60  ;;  %v224_v35 = vmul.f32 %v190_v6, %v932_v60 }
  0x5e   : > { %v217_v38 = vmul.f32 %v953_v10, %v202_v30  ;;  %v205_v39 = vadd.f32 %v204_v31, %v203_v28  ;;  %v227_v40 = vsub.f32 %v204_v31, %v203_v28  ;;  %v207_v41 = vmul.f32 %v206_v1, %v156_v33 }
  0x5f   : > { %v197_v29 = vsub.f32 %v195_v14, %v196_v9  ;;  %v194_v36 = vadd.f32 %v193_v27, %v191_v26  ;;  %v219_v43 = vmul.f32 %v190_v6, %v156_v33  ;;  %v222_v44 = vsub.f32 0.0, %v156_v33 }
  0x60   : > { %v212_v46 = vmul.f32 %v953_v10, %v205_v39  ;;  %v231_v48 = vmul.f32 %v227_v40, %v953_v10  ;;  %v226_v49 = vadd.f32 %v201_v16, %v199_v15  ;;  %v113_v59 = vmul.f32 %v692_v12, %v870_v22 }
  0x61   : > { %v215_v37 = vmul.f32 %v208_v7, %v197_v29  ;;  %v209_v42 = vmul.f32 %v208_v7, %v194_v36  ;;  %v221_v51 = vsub.f32 %v219_v43, %v220_v32  ;;  %v223_v52 = vmul.f32 %v222_v44, %v192_v8 }
  0x62   : > { %v236_v55 = vmul.f32 %v226_v49, %v953_v10  ;;  %v125_v6 = vstv %s124_s17  ;;  %v127_v9 = vstv %s792_s22  ;;  %v172_v15 = vmul.f32 %v873_v23, %v113_v59 }
  0x63   : > { %v216_v45 = vadd.f32 %v215_v37, %v214_v11  ;;  %v210_v50 = vadd.f32 %v209_v42, %v207_v41  ;;  %v228_v57 = vmul.f32 %v221_v51, %v208_v7  ;;  %v225_v58 = vsub.f32 %v223_v52, %v224_v35 }
  0x64   : > { %v114_v11 = vmul.f32 %v688_v13, %v870_v22  ;;  %v126_v14 = vmul.f32 %v676_v20, %v125_v6  ;;  %v176_v16 = vmul.f32 %v876_v24, %v113_v59  ;;  %v128_v12 = vmul.f32 %v684_v18, %v127_v9 }
  0x65   : > { %v218_v54 = vadd.f32 %v217_v38, %v216_v45  ;;  %v213_v56 = vsub.f32 %v210_v50, %v212_v46  ;;  %v230_v8 = vadd.f32 %v229_v34, %v228_v57  ;;  %v233_v1 = vmul.f32 %v225_v58, %v208_v7 }
  0x66   : > { %v143_v17 = vstv %s788_s21  ;;  %v173_v27 = vmul.f32 %v876_v24, %v114_v11  ;;  %v175_v28 = vmul.f32 %v873_v23, %v114_v11  ;;  %v129_v7 = vadd.f32 %v128_v12, %v126_v14 }
  0x67   : > { %265 = vrot.lane.b32.xlu0 %v218_v54, %s728_s11  ;;  %262 = vrot.lane.b32.xlu1 %v213_v56, %s728_s11  ;;  %v232_v25 = vadd.f32 %v231_v48, %v230_v8  ;;  %v235_v26 = vadd.f32 %v234_v53, %v233_v1  ;;  %v144_v29 = vmul.f32 %v676_v20, %v143_v17  ;;  %v145_v13 = vstv %s808_s28 }
  0x68   : > { %v238_v22 = vmul.f32 %v935_v61, %v156_v33  ;;  %v174_v31 = vadd.f32 %v173_v27, %v172_v15  ;;  %v177_v18 = vsub.f32 %v175_v28, %v176_v16  ;;  %v239_v32 = vmul.f32 %v943_v0, %v932_v60 }
  0x69   : > { %v237_v30 = vsub.f32 %v235_v26, %v236_v55  ;;  %v146_v36 = vadd.f32 %v145_v13, %v144_v29  ;;  %v147_v24 = vmul.f32 %v916_v47, %v129_v7  ;;  %v241_v23 = vmul.f32 %v935_v61, %v932_v60 }
  0x6a   : > { %v242_v20 = vmul.f32 %v943_v0, %v156_v33  ;;  %v240_v34 = vadd.f32 %v239_v32, %v238_v22  ;;  %v244_v35 = vmul.f32 %v935_v61, %v937_v62  ;;  %v245_v37 = vmul.f32 %v943_v0, %v939_v63 }
  0x6b   : > { %274 = vrot.lane.b32.xlu0 %v232_v25, %s729_s29  ;;  %277 = vrot.lane.b32.xlu1 %v237_v30, %s729_s29  ;;  %v247_v38 = vmul.f32 %v943_v0, %v937_v62  ;;  %v248_v40 = vmul.f32 %v935_v61, %v939_v63  ;;  %v254_v41 = vstv %s253_s18  ;;  %v258_v42 = vstv %s257_s30 }
  0x6c   : > { %v243_v39 = vsub.f32 %v241_v23, %v242_v20  ;;  %v246_v60 = vsub.f32 %v244_v35, %v245_v37  ;;  %v1012_v20 = vadd.f32 %v147_v24, %v146_v36   ;;  %v260_v44 = vmul.f32 %v254_v41, %v948_v5 }
  0x6d   : > { %v249_v33 = vadd.f32 %v248_v40, %v247_v38  ;;  %v255_v46 = vmul.f32 %v254_v41, %v946_v3  ;;  %v130_v62 = vmul.f32 %v672_v21, %v125_v6  ;;  %v131_v0 = vmul.f32 %v680_v19, %v127_v9 }
  0x6e   : > { %v250_v43 = vsub.f32 %v240_v34, %v246_v60  ;;  %v149_v49 = vmul.f32 %v672_v21, %v143_v17  ;;  %v311_v50 = vrot.slane %v1012_v20, 6  ;;  %vm318_vm10 = vcmask 1041408  }
  0x6f   : > { %280 = vrot.lane.b32.xlu0 %v174_v31, %s729_s29  ;;  %283 = vrot.lane.b32.xlu1 %v177_v18, %s729_s29  ;;  %v251_v45 = vsub.f32 %v243_v39, %v249_v33  ;;  %v132_v48 = vadd.f32 %v131_v0, %v130_v62  ;;  %vm320_vm11 = vcmask 1042432   ;;  %vm322_vm12 = vcmask 1043456  }
  0x70   : > { %v259_v61 = vmul.f32 %v258_v42, %v250_v43  ;;  %vm324_vm13 = vcmask 1044480   ;;  %vm326_vm14 = vcmask 1045504   ;;  %vm328_vm15 = vcmask 1046528  }
  0x71   : > { %v252_v63 = vmul.f32 %v251_v45, %v953_v10  ;;  %v150_v51 = vmul.f32 %v916_v47, %v132_v48 }
  0x72   : > { %v261_v19 = vadd.f32 %v260_v44, %v259_v61  }
  0x73   : > { %v256_v18 = vadd.f32 %v255_v46, %v252_v63   ;;  %v151_v21 = vadd.f32 %v150_v51, %v149_v49  }
  0x74   : > { %v308_v5 = vrot.slane %v261_v19, 7 }
  0x75   : > { %v314_v53 = vrot.slane %v151_v21, 5 }
  0x76   : > { %v330_v3 = vsel %vm316_vm9, %v256_v18, %v308_v5 }
  0x77   : > { %v331_v52 = vsel %vm318_vm10, %v330_v3, %v311_v50 }
  0x78   : > { %v332_v54 = vsel %vm320_vm11, %v331_v52, %v314_v53 }
  0x79   : > { %336 = vst [vmem:[%s1028_s10 + $0x8] sm:$0xf] %v332_v54  ;;  %385 = vst [vmem:[#allocation2 + $0x8] sm:$0xf] (%p1053_p9), %v332_v54 }
  0xc6   : > { %v269_v47 = vpop.permute.xlu0 %268  ;;  %v272_v10 = vpop.permute.xlu1 %271 }
  0xc7   : > { %v270_v8 = vsel %vm810_vm2, %v269_v47, 0.0   ;;  %v273_v9 = vsel %vm810_vm2, %v272_v10, 0.0  }
  0xc8   : > { %v290_v58 = vrot.slane %v270_v8, 6  ;;  %v293_v59 = vrot.slane %v273_v9, 5 }
  0xd9   : > { %v266_v55 = vpop.permute.xlu0 %265  ;;  %v263_v56 = vpop.permute.xlu1 %262 }
  0xda   : > { %v267_v7 = vsel %vm810_vm2, %v266_v55, 0.0   ;;  %v264_v6 = vsel %vm810_vm2, %v263_v56, 0.0  }
  0xdb   : > { %v287_v57 = vrot.slane %v267_v7, 7 }
  0xdd   : > { %v317_v1 = vsel %vm316_vm9, %v264_v6, %v287_v57  ;;  %v275_v14 = vpop.permute.xlu0 %274  ;;  %v278_v12 = vpop.permute.xlu1 %277 }
  0xde   : > { %v319_v11 = vsel %vm318_vm10, %v317_v1, %v290_v58  ;;  %v276_v10 = vsel %vm48_vm3, %v275_v14, 0.0  }
  0xdf   : > { %v321_v15 = vsel %vm320_vm11, %v319_v11, %v293_v59  ;;  %v296_v16 = vrot.slane %v276_v10, 4  ;;  %v279_v11 = vsel %vm48_vm3, %v278_v12, 0.0  }
  0xe0   : > { %v299_v25 = vrot.slane %v279_v11, 3 }
  0xe1   : > { %v323_v17 = vsel %vm322_vm12, %v321_v15, %v296_v16  ;;  %v281_v26 = vpop.permute.xlu0 %280  ;;  %v284_v28 = vpop.permute.xlu1 %283  ;;  %89 = sbr.rel (!%p1053_p9) target bundleno = 77 (0x4d), region = 32 }
  0xe2   : > { %v282_v12 = vsel %vm48_vm3, %v281_v26, 0.0   ;;  %v325_v29 = vsel %vm324_vm13, %v323_v17, %v299_v25  ;;  %v285_v13 = vsel %vm48_vm3, %v284_v28, 0.0  }
  0xe3   : > { %v302_v27 = vrot.slane %v282_v12, 2  ;;  %v305_v30 = vrot.slane %v285_v13, 1 }
  0xe5   : > { %v327_v22 = vsel %vm326_vm14, %v325_v29, %v302_v27 }
  0xe6   : > { %v329_v31 = vsel %vm328_vm15, %v327_v22, %v305_v30 }
  0xe7   : > { %335 = vst [vmem:[%s1028_s10] sm:$0xff] %v329_v31  ;;  %384 = vst [vmem:[#allocation2] sm:$0xff] (%p1053_p9), %v329_v31 }

</bundles_post_ra>
